<compile_context>
chip_gen: v7x
topology: tpu7x:2x2x1
jax: 0.10.0
libtpu: 0.0.40
codegen_flags: <defaults>
</compile_context>

<pallas_src>
import functools

import jax
import jax.numpy as jnp
from jax.experimental import pallas as pl
from jax.experimental.pallas import tpu as pltpu


_ACTIVATIONS = ("relu", "sigmoid", "leaky_relu", "tanh")


def _apply_activation(y, activation, negative_slope):
    if activation == "relu":
        return jnp.maximum(y, 0.0)
    if activation == "sigmoid":
        return jax.nn.sigmoid(y)          # EUP slot -> effectively free under MXU
    if activation == "leaky_relu":
        return jnp.where(y >= 0.0, y, negative_slope * y)
    return jnp.tanh(y)                    # "tanh"


def _mask_k_tail(x, w, k_tail):
    """Zero the K-overhang columns of BOTH MXU operands on the last k step.

    Both sides are masked so stale-VMEM garbage (possibly NaN/Inf) in the
    overhang can never corrupt valid outputs via 0*NaN.  Statically skipped
    (k_tail == 0) whenever D_in is covered exactly by the K grid.
    """
    if k_tail == 0:
        return x, w
    k = pl.program_id(2)
    nk = pl.num_programs(2)
    tk = x.shape[1]
    limit = jnp.where(k == nk - 1, tk - k_tail, tk)
    colx = jax.lax.broadcasted_iota(jnp.int32, x.shape, 1)
    colw = jax.lax.broadcasted_iota(jnp.int32, w.shape, 1)
    return jnp.where(colx < limit, x, 0), jnp.where(colw < limit, w, 0)


def _dense_kernel_f32(x_ref, w_ref, b_ref, o_ref, *,
                      activation, negative_slope, k_tail):
    """float32 output: accumulate directly into the VMEM-resident output block."""
    k = pl.program_id(2)
    nk = pl.num_programs(2)

    @pl.when(k == 0)
    def _():
        o_ref[...] = jnp.zeros_like(o_ref)

    x, w = _mask_k_tail(x_ref[...], w_ref[...], k_tail)
    # x: (tm, tk), w: (tn, tk) native nn.Linear layout -> contract dim 1 of both
    # (transposed-RHS matmul on the MXU; no HBM transpose / pad pass for weight).
    o_ref[...] += jax.lax.dot_general(
        x, w,
        dimension_numbers=(((1,), (1,)), ((), ())),
        preferred_element_type=jnp.float32,
    )

    @pl.when(k == nk - 1)
    def _():
        y = o_ref[...] + b_ref[...]       # bias (1, tn) broadcasts over rows
        o_ref[...] = _apply_activation(y, activation, negative_slope)


def _dense_kernel_acc(x_ref, w_ref, b_ref, o_ref, acc_ref, *,
                      activation, negative_slope, k_tail):
    """Non-f32 output: keep an f32 scratch accumulator, cast once at the end."""
    k = pl.program_id(2)
    nk = pl.num_programs(2)

    @pl.when(k == 0)
    def _():
        acc_ref[...] = jnp.zeros_like(acc_ref)

    x, w = _mask_k_tail(x_ref[...], w_ref[...], k_tail)
    acc_ref[...] += jax.lax.dot_general(
        x, w,
        dimension_numbers=(((1,), (1,)), ((), ())),
        preferred_element_type=jnp.float32,
    )

    @pl.when(k == nk - 1)
    def _():
        y = acc_ref[...] + b_ref[...]
        o_ref[...] = _apply_activation(y, activation, negative_slope).astype(o_ref.dtype)


def _round_up(x: int, m: int) -> int:
    return ((x + m - 1) // m) * m


def _fit_tile(dim_rounded: int, unit: int, target: int) -> int:
    """Largest multiple of `unit` that divides `dim_rounded` and is <= target."""
    n = dim_rounded // unit
    best = unit
    for d in range(1, n + 1):
        if n % d == 0 and d * unit <= target:
            best = d * unit
    return best


def _pick_tile(dim: int, unit: int, target: int) -> int:
    """Tile for one dim: a single full-extent block if it fits the target,
    otherwise a divisor of the unit-rounded dim (fringe waste < unit)."""
    if dim <= target:
        return dim                                     # full-dim block: always legal
    return _fit_tile(_round_up(dim, unit), unit, target)


def dense_forward(x, weight, bias, *, activation="relu", negative_slope=0.01,
                  tm_target=1024, tn_target=512, tk_target=1024,
                  compute_dtype=None,
                  vmem_limit_bytes=32 * 1024 * 1024):
    """Pallas equivalent of Dense.forward (batch_norm=False).

    x:      (B, D_in)      float32
    weight: (D_out, D_in)  PyTorch nn.Linear layout (not transposed, not padded)
    bias:   (D_out,)
    returns (B, D_out) in x.dtype
    """
    if activation not in _ACTIVATIONS:
        raise AssertionError(
            f"Unknown activation {activation}, please provide a proper activation function."
        )

    B, D_in = x.shape
    D_out, D_in_w = weight.shape
    assert D_in_w == D_in, (weight.shape, x.shape)

    out_dtype = x.dtype

    # Optional reduced-precision MXU inputs (f32 accumulation preserved).
    # TODO(synk): for repeated calls with static weights, persist the weight in
    # compute_dtype instead of casting per forward call.
    if compute_dtype is not None:
        x = x.astype(compute_dtype)
        weight = weight.astype(compute_dtype)

    in_bytes = jnp.dtype(x.dtype).itemsize
    out_bytes = jnp.dtype(out_dtype).itemsize
    m_unit = 8 if in_bytes >= 4 else 16        # sub-32-bit packs 2 rows per sublane

    # Fit tiles to the (m_unit, 128)-rounded dims.  B <= tm_target -> one M tile
    # covers the whole batch, so the weight is streamed from HBM exactly once.
    tm = _pick_tile(B, m_unit, tm_target)
    tn = _pick_tile(D_out, 128, tn_target)
    tk = _pick_tile(D_in, 128, tk_target)

    # VMEM budget guard: double-buffered x/w/out (+ optional f32 acc) must leave
    # headroom under the scoped limit (valid on v5e/v6e/v7x alike).
    def _footprint(_tm, _tn, _tk):
        fp = 2 * _tm * _tk * in_bytes + 2 * _tn * _tk * in_bytes + 2 * _tm * _tn * out_bytes
        if out_dtype != jnp.float32:
            fp += _tm * _tn * 4
        return fp

    budget = vmem_limit_bytes - 6 * 1024 * 1024
    while _footprint(tm, tn, tk) > budget and (
            tk_target > 128 or tn_target > 128 or tm_target > m_unit):
        if tk_target >= max(tn_target, tm_target):
            tk_target = max(128, tk_target // 2)
        elif tn_target >= tm_target:
            tn_target = max(128, tn_target // 2)
        else:
            tm_target = max(m_unit, tm_target // 2)
        tm = _pick_tile(B, m_unit, tm_target)
        tn = _pick_tile(D_out, 128, tn_target)
        tk = _pick_tile(D_in, 128, tk_target)

    grid = (pl.cdiv(B, tm), pl.cdiv(D_out, tn), pl.cdiv(D_in, tk))
    # Columns past D_in in the last K block are garbage -> masked in-kernel.
    # (M/N fringes are safe: out-of-bounds output writes are dropped.)
    k_tail = grid[2] * tk - D_in

    b2d = bias.reshape(1, D_out).astype(jnp.float32)

    common = dict(activation=activation, negative_slope=negative_slope, k_tail=k_tail)
    if out_dtype == jnp.float32:
        kernel = functools.partial(_dense_kernel_f32, **common)
        scratch = []                                   # accumulate in o_ref itself
    else:
        kernel = functools.partial(_dense_kernel_acc, **common)
        scratch = [pltpu.VMEM((tm, tn), jnp.float32)]  # f32 accumulator

    return pl.pallas_call(
        kernel,
        out_shape=jax.ShapeDtypeStruct((B, D_out), out_dtype),
        grid_spec=pltpu.PrefetchScalarGridSpec(
            num_scalar_prefetch=0,
            grid=grid,
            in_specs=[
                pl.BlockSpec((tm, tk), lambda i, j, k: (i, k)),   # x tile
                pl.BlockSpec((tn, tk), lambda i, j, k: (j, k)),   # weight tile (native layout)
                pl.BlockSpec((1, tn), lambda i, j, k: (0, j)),    # bias tile
            ],
            out_specs=pl.BlockSpec((tm, tn), lambda i, j, k: (i, j)),
            scratch_shapes=scratch,
        ),
        compiler_params=pltpu.CompilerParams(
            dimension_semantics=("parallel", "parallel", "arbitrary"),
            vmem_limit_bytes=vmem_limit_bytes,
        ),
    )(x, weight, b2d)


# TODO(synk): batch_norm=True path is not implemented -- the reference module calls
# nn.BatchNorm1d() with no num_features, which itself raises in PyTorch; default
# (batch_norm=False) semantics are reproduced exactly.


def _ref_dense(x, weight, bias, activation, negative_slope=0.01):
    y = jnp.dot(x, weight.T, precision=jax.lax.Precision.HIGHEST) + bias
    if activation == "relu":
        return jnp.maximum(y, 0.0)
    if activation == "sigmoid":
        return jax.nn.sigmoid(y)
    if activation == "leaky_relu":
        return jnp.where(y >= 0.0, y, negative_slope * y)
    return jnp.tanh(y)


if __name__ == "__main__":
    key = jax.random.PRNGKey(0)
    k_x, k_w, k_b, k_x2, k_w2, k_b2 = jax.random.split(key, 6)

    ok = True

    # --- Small test (module-scale shapes, no padding / single block) ---
    batch, input_dim, output_dim = 8, 32, 16
    x = jax.random.normal(k_x, (batch, input_dim), dtype=jnp.float32)
    bound = 1.0 / jnp.sqrt(jnp.float32(input_dim))
    weight = jax.random.uniform(k_w, (output_dim, input_dim), dtype=jnp.float32,
                                minval=-bound, maxval=bound)
    bias = jax.random.uniform(k_b, (output_dim,), dtype=jnp.float32,
                              minval=-bound, maxval=bound)

    for act in ("relu", "sigmoid", "leaky_relu", "tanh"):
        y = jax.block_until_ready(dense_forward(x, weight, bias, activation=act))
        y_ref = _ref_dense(x, weight, bias, act)
        ok &= y.shape == (batch, output_dim)
        ok &= bool(jnp.allclose(y, y_ref, atol=2e-3, rtol=2e-3))

    # --- Ragged test with forced small tiles: exercises M/N/K tiling, the K-tail
    #     in-kernel mask, and the dropped M/N output fringes ---
    B2, Din2, Dout2 = 70, 300, 200
    x2 = jax.random.normal(k_x2, (B2, Din2), dtype=jnp.float32)
    bound2 = 1.0 / jnp.sqrt(jnp.float32(Din2))
    w2 = jax.random.uniform(k_w2, (Dout2, Din2), dtype=jnp.float32,
                            minval=-bound2, maxval=bound2)
    b2 = jax.random.uniform(k_b2, (Dout2,), dtype=jnp.float32,
                            minval=-bound2, maxval=bound2)
    y2_ref = _ref_dense(x2, w2, b2, "relu")

    y2 = jax.block_until_ready(
        dense_forward(x2, w2, b2, activation="relu",
                      tm_target=32, tn_target=128, tk_target=128))
    ok &= y2.shape == (B2, Dout2)
    ok &= bool(jnp.allclose(y2, y2_ref, atol=2e-3, rtol=2e-3))

    # Same shapes with default targets: single full-extent (unaligned) blocks.
    y3 = jax.block_until_ready(dense_forward(x2, w2, b2, activation="relu"))
    ok &= bool(jnp.allclose(y3, y2_ref, atol=2e-3, rtol=2e-3))

    # bf16 MXU inputs (f32 accumulation kept) -- looser tolerance.
    y4 = jax.block_until_ready(
        dense_forward(x2, w2, b2, activation="relu", compute_dtype=jnp.bfloat16))
    ok &= bool(jnp.allclose(y4, y2_ref, atol=1e-1, rtol=5e-2))

    assert ok, "Pallas Dense kernel mismatch vs reference"
    print("KERNEL_OK")
</pallas_src>

<mosaic_0001>
module attributes {stable_mosaic.version = 11 : i64} {
  func.func @_dense_kernel_f32(%arg0: i32, %arg1: i32, %arg2: i32, %arg3: memref<8x32xf32, #tpu.memory_space<vmem>>, %arg4: memref<16x32xf32, #tpu.memory_space<vmem>>, %arg5: memref<1x16xf32, #tpu.memory_space<vmem>>, %arg6: memref<8x16xf32, #tpu.memory_space<vmem>>) attributes {dimension_semantics = [#tpu.dimension_semantics<parallel>, #tpu.dimension_semantics<parallel>, #tpu.dimension_semantics<arbitrary>], iteration_bounds = array<i64: 1, 1, 1>, scalar_prefetch = 0 : i64, scratch_operands = 0 : i64, tpu.core_type = #tpu.core_type<tc>, window_params = [{transform_indices = @transform_0, window_bounds = array<i64: 8, 32>}, {transform_indices = @transform_1, window_bounds = array<i64: 16, 32>}, {transform_indices = @transform_2, window_bounds = array<i64: 1, 16>}, {transform_indices = @transform_3, window_bounds = array<i64: 8, 16>}]} {
    %c0_i32 = arith.constant 0 : i32
    %0 = arith.cmpi eq, %arg2, %c0_i32 : i32
    %1 = arith.extui %0 : i1 to i32
    %c0_i32_0 = arith.constant 0 : i32
    %2 = arith.cmpi ne, %1, %c0_i32_0 : i32
    scf.if %2 {
      %cst_10 = arith.constant 0.000000e+00 : f32
      %12 = vector.broadcast %cst_10 : f32 to vector<8x16xf32>
      %c0_11 = arith.constant 0 : index
      %c0_12 = arith.constant 0 : index
      %13 = vector.load %arg6[%c0_11, %c0_12] : memref<8x16xf32, #tpu.memory_space<vmem>>, vector<8x16xf32>
      tpu.vector_store %arg6[%c0_11, %c0_12], %12 {strides = array<i32>} : memref<8x16xf32, #tpu.memory_space<vmem>>, vector<8x16xf32>,
    } else {
    }
    %c0 = arith.constant 0 : index
    %c0_1 = arith.constant 0 : index
    %3 = vector.load %arg3[%c0, %c0_1] : memref<8x32xf32, #tpu.memory_space<vmem>>, vector<8x32xf32>
    %c0_2 = arith.constant 0 : index
    %c0_3 = arith.constant 0 : index
    %4 = vector.load %arg4[%c0_2, %c0_3] : memref<16x32xf32, #tpu.memory_space<vmem>>, vector<16x32xf32>
    %c0_4 = arith.constant 0 : index
    %c0_5 = arith.constant 0 : index
    %5 = vector.load %arg6[%c0_4, %c0_5] : memref<8x16xf32, #tpu.memory_space<vmem>>, vector<8x16xf32>
    %cst = arith.constant dense<0.000000e+00> : vector<8x16xf32>
    %6 = tpu.matmul %3, %4, %cst {dimension_numbers = #tpu.dot_dimension_numbers<[1], [1], [0], [0], [0, 0, 1, 0], [], []>} : vector<8x32xf32>, vector<16x32xf32>, vector<8x16xf32> -> vector<8x16xf32>
    %7 = arith.addf %5, %6 : vector<8x16xf32>
    %c0_6 = arith.constant 0 : index
    %c0_7 = arith.constant 0 : index
    %8 = vector.load %arg6[%c0_6, %c0_7] : memref<8x16xf32, #tpu.memory_space<vmem>>, vector<8x16xf32>
    tpu.vector_store %arg6[%c0_6, %c0_7], %7 {strides = array<i32>} : memref<8x16xf32, #tpu.memory_space<vmem>>, vector<8x16xf32>,
    %c0_i32_8 = arith.constant 0 : i32
    %9 = arith.cmpi eq, %arg2, %c0_i32_8 : i32
    %10 = arith.extui %9 : i1 to i32
    %c0_i32_9 = arith.constant 0 : i32
    %11 = arith.cmpi ne, %10, %c0_i32_9 : i32
    scf.if %11 {
      %c0_10 = arith.constant 0 : index
      %c0_11 = arith.constant 0 : index
      %12 = vector.load %arg6[%c0_10, %c0_11] : memref<8x16xf32, #tpu.memory_space<vmem>>, vector<8x16xf32>
      %c0_12 = arith.constant 0 : index
      %c0_13 = arith.constant 0 : index
      %13 = vector.load %arg5[%c0_12, %c0_13] : memref<1x16xf32, #tpu.memory_space<vmem>>, vector<1x16xf32>
      %14 = vector.broadcast %13 : vector<1x16xf32> to vector<8x16xf32>
      %15 = arith.addf %12, %14 : vector<8x16xf32>
      %cst_14 = arith.constant 0.000000e+00 : f32
      %16 = vector.broadcast %cst_14 : f32 to vector<8x16xf32>
      %17 = arith.maximumf %15, %16 : vector<8x16xf32>
      %c0_15 = arith.constant 0 : index
      %c0_16 = arith.constant 0 : index
      %18 = vector.load %arg6[%c0_15, %c0_16] : memref<8x16xf32, #tpu.memory_space<vmem>>, vector<8x16xf32>
      tpu.vector_store %arg6[%c0_15, %c0_16], %17 {strides = array<i32>} : memref<8x16xf32, #tpu.memory_space<vmem>>, vector<8x16xf32>,
    } else {
    }
    return
  }
  func.func @transform_0(%arg0: i32, %arg1: i32, %arg2: i32) -> (i32, i32) {
    %c0_i32 = arith.constant 0 : i32
    return %arg0, %arg2 : i32, i32
  }
  func.func @transform_1(%arg0: i32, %arg1: i32, %arg2: i32) -> (i32, i32) {
    %c0_i32 = arith.constant 0 : i32
    return %arg1, %arg2 : i32, i32
  }
  func.func @transform_2(%arg0: i32, %arg1: i32, %arg2: i32) -> (i32, i32) {
    %c0_i32 = arith.constant 0 : i32
    %c0_i32_0 = arith.constant 0 : i32
    return %c0_i32, %arg1 : i32, i32
  }
  func.func @transform_3(%arg0: i32, %arg1: i32, %arg2: i32) -> (i32, i32) {
    %c0_i32 = arith.constant 0 : i32
    return %arg0, %arg1 : i32, i32
  }
}

</mosaic_0001>

<bundles_post_ra>
// kernel: tpu_custom_call.1
= control target key start
LH: loop header
LB: loop body
LE: loop exit
PB: predicated region body
PF: predicated region fallthrough
CT: control target
= control target key end

     0   :  { %8 = vsyncpa [#allocation3], 0  ;;  %s339_s0 = inlined_call_operand.hbm [shape: f32[8,32], index: 0, kind: input, shape index: {}]   ;;  %s340_s1 = inlined_call_operand.hbm [shape: f32[16,32], index: 1, kind: input, shape index: {}]   ;;  %s341_s2 = inlined_call_operand.vmem [shape: f32[1,16], index: 2, kind: input, shape index: {}]   ;;  %s342_s3 = inlined_call_operand.hbm [shape: f32[8,16], index: 3, kind: output, shape index: {}]  }
   0x1   :  { %9 = vsyncpa [#allocation6], 0 }
   0x2   :  { %10 = vsyncpa [#allocation4], 0  ;;  %s262_s12 = smov [#allocation2]   ;;  %s263_s14 = smov [#allocation5]  }
   0x3   :  { %s17_s13 = sshll.u32 %s262_s12, 4  ;;  %s26_s15 = sshll.u32 %s263_s14, 4  ;;  %s18_s13 = int_to_ptr.vmem [resolvable:$true] %s17_s13  ;;  %s290_s15 = int_to_ptr.vmem [resolvable:$true] %s26_s15 }
   0x4   :  { %s190_s18 = scalar_lea.hbm %s339_s0, 128 }
   0x5   :  { %p191_p0 = scmp.ne.s32.totalorder %s339_s0, %s190_s18  ;;  %p194_p1 = scmp.lt.u32.totalorder %s190_s18, %s339_s0 }
   0x7   :  { %p196_p2 = pnand %p194_p1, %p191_p0 }
   0x9   :  { %199 = shalt.err (!%p196_p2)
}
   0xa   :  { %s200_s23 = scalar_lea.vmem %s18_s13, 128  ;;  %p205_p4 = scmp.lt.s32.totalorder %s18_s13, %s18_s13 }
   0xb   :  { %p201_p3 = scmp.ne.s32.totalorder %s18_s13, %s200_s23  ;;  %p206_p5 = scmp.lt.s32.totalorder %s200_s23, %s200_s23 }
   0xd   :  { %p207_p6 = por %p206_p5, %p205_p4 }
   0xf   :  { %p208_p7 = pnand %p207_p6, %p201_p3 }
  0x11   :  { %211 = shalt.err (!%p208_p7)
}
  0x12   :  { %20 = dma.hbm_to_vmem [thread:$0]  %s339_s0, 128, %s18_s13, [#allocation3]  }
  0x13   :  { %s212_s28 = scalar_lea.hbm %s340_s1, 256 }
  0x14   :  { %p213_p8 = scmp.ne.s32.totalorder %s340_s1, %s212_s28  ;;  %p216_p9 = scmp.lt.u32.totalorder %s212_s28, %s340_s1 }
  0x16   :  { %p218_p10 = pnand %p216_p9, %p213_p8 }
  0x18   :  { %221 = shalt.err (!%p218_p10)
}
  0x19   :  { %s222_s6 = scalar_lea.vmem %s290_s15, 256  ;;  %p227_p12 = scmp.lt.s32.totalorder %s290_s15, %s290_s15 }
  0x1a   :  { %p223_p11 = scmp.ne.s32.totalorder %s290_s15, %s222_s6  ;;  %p228_p13 = scmp.lt.s32.totalorder %s222_s6, %s222_s6 }
  0x1c   :  { %p229_p0 = por %p228_p13, %p227_p12 }
  0x1e   :  { %p230_p1 = pnand %p229_p0, %p223_p11 }
  0x20   :  { %233 = shalt.err (!%p230_p1)
}
  0x21   :  { %s264_s0 = smov 128   ;;  %s265_s7 = smov 8  }
  0x22   :  { %32 = dma.hbm_to_vmem [thread:$0]  %s340_s1, 256, %s290_s15, [#allocation6], %s264_s0, %s264_s0, %s265_s7  }
  0x23   :  { %256 = dma.done.wait [#allocation3], 128  }
  0x24   :  { %257 = vsyncadd [#allocation3], 4294967168 }
  0x25   :  { %258 = dma.done.wait [#allocation6], 256  }
  0x26   :  { %259 = vsyncadd [#allocation6], 4294967040  ;;  %vm45_vm0 = vcmask 130048   ;;  %v266_v0 = vmov 0.0|0.0   ;;  %v267_v1 = vmov 0.0   ;;  %vm268_vm1 = vmmov 0  }
  0x27   :  { %178 = vmatprep.subr.bf16.mxu0 %v266_v0  ;;  %46 = vst.msk [vmem:[#allocation7] sm:$0xff] %vm45_vm0, %v267_v1  ;;  %175 = vmatprep.mubr.msk.f32.mxu0 %vm268_vm1, %v267_v1  ;;  %vm51_vm2 = vcmask 261120   ;;  %v48_v2 = vld [vmem:[#allocation5] sm:$0xff]  ;;  %v49_v3 = vld [vmem:[#allocation5 + $0x8] sm:$0xff]  ;;  %v47_v5 = vld [vmem:[#allocation2] sm:$0xff]  ;;  %s269_s11 = smov [#allocation7]  }
  0x28   :  { %vm180_vm3 = vmpackc.low %vm51_vm2, %vm51_vm2  ;;  %v179_v4 = vpack.c.bf16 %v49_v3, %v48_v2  ;;  %v167_v10 = vld [vmem:[%s341_s2] ss:$0 sm:$0xff]  ;;  %s154_s12 = sshll.u32 %s269_s11, 4  ;;  %s155_s12 = int_to_ptr.vmem [resolvable:$true] %s154_s12 }
  0x29   :  { %s234_s13 = scalar_lea.vmem %s155_s12, 128  ;;  %p239_p3 = scmp.lt.s32.totalorder %s155_s12, %s155_s12 }
  0x2a   :  { %181 = vmatpush3.bf16.xpose.msk.msra.mxu0 %vm180_vm3, %v179_v4  ;;  %p235_p2 = scmp.ne.s32.totalorder %s155_s12, %s234_s13  ;;  %p240_p4 = scmp.lt.s32.totalorder %s234_s13, %s234_s13 }
  0x2c   :  { %p241_p5 = por %p240_p4, %p239_p3 }
  0x2e   :  { %v50_v6 = vld [vmem:[#allocation7] sm:$0xff]  ;;  %p242_p6 = pnand %p241_p5, %p235_p2 }
  0x31   :  { %176 = vmatmul.mubr.msk.f32.vlgmr.msra.gmra.mrb[0].mxu0 %vm51_vm2, %v47_v5 }
 0x104   :  { %v127_v7 = vpop.f32.mrb[0].mxu0 }
 0x105   :  { %v131_v8 = vadd.f32 %v127_v7, %v50_v6  ;;  %v177_v9 = vpop.f32.mrb[1].mxu0 }
 0x107   :  { %133 = vst.msk [vmem:[#allocation7] sm:$0xff] %vm45_vm0, %v131_v8 }
 0x10e   :  { %v137_v11 = vld [vmem:[#allocation7] sm:$0xff] }
 0x10f   :  { %v145_v12 = vadd.f32 %v167_v10, %v137_v11 }
 0x111   :  { %v146_v13 = vmax.f32 %v145_v12, 0.0 }
 0x113   :  { %147 = vst.msk [vmem:[#allocation7] sm:$0xff] %vm45_vm0, %v146_v13 }
 0x114   :  { %245 = shalt.err (!%p242_p6)
}
 0x115   :  { %s246_s16 = scalar_lea.hbm %s342_s3, 128 }
 0x116   :  { %p247_p7 = scmp.ne.s32.totalorder %s342_s3, %s246_s16  ;;  %p250_p8 = scmp.lt.u32.totalorder %s246_s16, %s342_s3 }
 0x118   :  { %p252_p9 = pnand %p250_p8, %p247_p7 }
 0x11a   :  { %255 = shalt.err (!%p252_p9)
}
 0x11b   :  { %157 = dma.vmem_to_hbm [thread:$0]  %s155_s12, 128, %s342_s3, [#allocation4]  }
 0x11c   :  { %260 = dma.done.wait [#allocation4], 128  }
 0x11d   :  { %261 = vsyncadd [#allocation4], 4294967168 }
 0x11e   :  { %161 = vsyncpa [#allocation3], 1 }
 0x11f   :  { %162 = vsyncpa [#allocation6], 1 }
 0x120   :  { %163 = vsyncpa [#allocation4], 1 }

</bundles_post_ra>
